<compile_context>
chip_gen: v7x
topology: tpu7x:2x2x1
jax: 0.10.0
libtpu: 0.0.40
codegen_flags: <defaults>
</compile_context>

<pallas_src>
import functools

import jax
import jax.numpy as jnp
from jax import lax
from jax.experimental import pallas as pl
from jax.experimental.pallas import tpu as pltpu


def _row_in_image(rows, cols, H):
    """int32 (rows, cols) array: row index within its image (rows = B*H stacked)."""
    r = lax.broadcasted_iota(jnp.int32, (rows, cols), 0)
    if H & (H - 1) == 0:
        return jnp.bitwise_and(r, H - 1)
    return jnp.remainder(r, H)


def _shift_rows(p, lag):
    """q[r, :] = p[r - lag, :] (wraparound; boundary rows are masked by the caller)."""
    rows, cols = p.shape
    if rows % 8 == 0 and cols % 128 == 0:
        return pltpu.roll(p, lag % rows, 0)            # XLU sublane rotate (free slot)
    # Fallback for non-(8,128)-aligned shapes: tiny 0/1 shift matrix on the MXU.
    # Boundary rows come out 0 instead of wrapped, which is equivalent after masking.
    i = lax.broadcasted_iota(jnp.int32, (rows, rows), 0)
    j = lax.broadcasted_iota(jnp.int32, (rows, rows), 1)
    s = (i == j + lag).astype(p.dtype)
    return jnp.dot(s, p, preferred_element_type=jnp.float32)


def _shift_lanes(p, lag):
    """q[:, w] = p[:, w - lag] (wraparound; boundary lanes are masked by the caller)."""
    rows, cols = p.shape
    if rows % 8 == 0 and cols % 128 == 0:
        return pltpu.roll(p, lag % cols, 1)            # XLU lane rotate (free slot)
    i = lax.broadcasted_iota(jnp.int32, (cols, cols), 0)
    j = lax.broadcasted_iota(jnp.int32, (cols, cols), 1)
    t = (i == j - lag).astype(p.dtype)
    return jnp.dot(p, t, preferred_element_type=jnp.float32)


def _saconv_block_kernel(x_ref, mt_ref, mp_ref, mw_ref, brow_ref, y_ref, mo_ref,
                         *, H, W, Cout):
    # x_ref    : (1, B*H, Cin*W)   x rows (column index = ci*W + w), un-multiplied
    # mt_ref   : (1, B*H, Cin*W)   mask tiled over the Cin lane-groups
    # mp_ref   : (1, B*H, PW)      mask padded to PW (128-multiple) lanes with -inf
    # mw_ref   : (Cin*W, 3*W*Cout) structured conv weight slab (kw + column-pad baked in)
    # brow_ref : (1, W*Cout)       bias tiled over w (column index = w*Cout + co)
    # y_ref    : (1, B*H, W*Cout)  lane-dense conv output rows
    # mo_ref   : (1, B*H, W)       max-pooled mask
    BH = x_ref.shape[1]
    WCo = W * Cout
    PW = mp_ref.shape[2]
    f32 = jnp.float32
    NEG_INF = float("-inf")

    # ---- conv(x * m): fuse x*m in-kernel, then ONE MXU matmul with K = Cin*W ----
    xm = x_ref[0] * mt_ref[0]                                    # (B*H, Cin*W), VPU
    p_all = jnp.dot(xm, mw_ref[...],
                    preferred_element_type=f32,
                    precision=lax.Precision.HIGHEST)             # (B*H, 3*W*Cout)

    pm1 = p_all[:, 0:WCo]            # kernel row kh=0 -> contributes one row DOWN
    p0 = p_all[:, WCo:2 * WCo]       # kernel row kh=1 -> same row
    pp1 = p_all[:, 2 * WCo:3 * WCo]  # kernel row kh=2 -> contributes one row UP

    # Row halo via XLU rolls; mask the image-boundary rows (also kills cross-image wrap).
    h_in = _row_in_image(BH, WCo, H)
    down = jnp.where(h_in == 0, 0.0, _shift_rows(pm1, +1))       # y[h] += pm1[h-1]
    up = jnp.where(h_in == H - 1, 0.0, _shift_rows(pp1, -1))     # y[h] += pp1[h+1]
    y = p0 + down + up + brow_ref[...]                           # bias broadcast over rows
    y_ref[0] = jnp.maximum(y, 0.0)                               # ReLU; full-lane store

    # ---- 3x3 / stride-1 / pad-1 max pool of the mask (padding value = -inf) ----
    mp = mp_ref[0]                                               # (B*H, PW), lanes >= W = -inf
    col = lax.broadcasted_iota(jnp.int32, (BH, PW), 1)
    left = jnp.where(col == 0, NEG_INF, _shift_lanes(mp, +1))    # m[:, w-1]
    right = jnp.where(col == W - 1, NEG_INF, _shift_lanes(mp, -1))  # m[:, w+1]
    r3 = jnp.maximum(mp, jnp.maximum(left, right))               # max over dw

    h_in_p = _row_in_image(BH, PW, H)
    upr = jnp.where(h_in_p == 0, NEG_INF, _shift_rows(r3, +1))   # r3[h-1]
    dnr = jnp.where(h_in_p == H - 1, NEG_INF, _shift_rows(r3, -1))  # r3[h+1]
    pooled = jnp.maximum(r3, jnp.maximum(upr, dnr))              # max over dh
    mo_ref[0] = pooled[:, :W]                                    # narrow store (accepted)


def _build_conv_matrix(w_oihw, W):
    """(Cout, Cin, 3, 3) -> (Cin*W, 3*W*Cout) structured conv weight slab.

    slab[ci*W + w_in, kh*W*Cout + w_out*Cout + co] =
        w_oihw[co, ci, kh, (w_in - w_out) + 1]  if |w_in - w_out| <= 1 else 0
    (the column-boundary zero padding of the conv is baked in here, once, on weights).
    """
    Cout, Cin, KH, KW = w_oihw.shape
    assert KH == 3 and KW == 3, "SAConvBlock uses 3x3 kernels"
    wt = jnp.transpose(w_oihw, (2, 3, 1, 0)).astype(jnp.float32)   # (kh, kw, ci, co)
    wcols = jnp.arange(W)
    blocks = []
    for kh in range(KH):
        m_b = jnp.zeros((Cin, W, W, Cout), jnp.float32)
        for kw in range(KW):
            dw = kw - 1
            a_dw = (wcols[:, None] == (wcols[None, :] + dw)).astype(jnp.float32)  # [w_in, w_out]
            m_b = m_b + jnp.einsum('vw,ic->ivwc', a_dw, wt[kh, kw])
        blocks.append(m_b.reshape(Cin, W, W * Cout))
    slab = jnp.concatenate(blocks, axis=2)                         # (Cin, W, 3*W*Cout)
    return slab.reshape(Cin * W, 3 * W * Cout)


def _num_grid_steps(N):
    """One grid step on single-TC chips (v5e/v6e); two on multi-TC chips (v4/v5p/v7x)."""
    kind = ""
    try:
        kind = jax.devices()[0].device_kind.lower()
    except Exception:
        pass
    multi_tc = any(tag in kind for tag in ("v4", "v5p", "v7"))
    if multi_tc and N >= 2 and N % 2 == 0:
        return 2
    return 1


@functools.partial(jax.jit, static_argnames=("grid_steps", "nhwc_out"))
def _saconv_block_jit(x_nchw, m_nchw, w_oihw, bias, *, grid_steps, nhwc_out):
    N, Cin, H, W = x_nchw.shape
    Cout = w_oihw.shape[0]
    WCo = W * Cout
    CinW = Cin * W
    G = grid_steps
    B = N // G
    BH = B * H
    PW = ((W + 127) // 128) * 128          # 128-multiple lane width for the pool mask
    f32 = jnp.float32

    x = x_nchw.astype(f32)
    m3 = m_nchw.reshape(N, H, W).astype(f32)

    # Layout plumbing only (review-blessed): x rows with Cin fused onto lanes, and two
    # tiny mask variants (tiled over Cin for the x*m fusion; -inf padded for the pool).
    x_rows = jnp.transpose(x, (0, 2, 1, 3)).reshape(G, BH, CinW)
    m_tiled = jnp.tile(m3, (1, 1, Cin)).reshape(G, BH, CinW)
    m_pool = jnp.pad(m3, ((0, 0), (0, 0), (0, PW - W)),
                     constant_values=-jnp.inf).reshape(G, BH, PW)

    mw = _build_conv_matrix(w_oihw, W)                             # (Cin*W, 3*W*Cout)
    brow = jnp.tile(bias.astype(f32), (W,)).reshape(1, WCo)

    kernel = functools.partial(_saconv_block_kernel, H=H, W=W, Cout=Cout)

    y_rows, mo_rows = pl.pallas_call(
        kernel,
        out_shape=(
            jax.ShapeDtypeStruct((G, BH, WCo), f32),    # lane-dense conv output rows
            jax.ShapeDtypeStruct((G, BH, W), f32),      # pooled mask
        ),
        grid=(G,),
        in_specs=[
            pl.BlockSpec((1, BH, CinW), lambda n: (n, 0, 0)),
            pl.BlockSpec((1, BH, CinW), lambda n: (n, 0, 0)),
            pl.BlockSpec((1, BH, PW), lambda n: (n, 0, 0)),
            pl.BlockSpec((CinW, 3 * WCo), lambda n: (0, 0)),
            pl.BlockSpec((1, WCo), lambda n: (0, 0)),
        ],
        out_specs=(
            pl.BlockSpec((1, BH, WCo), lambda n: (n, 0, 0)),
            pl.BlockSpec((1, BH, W), lambda n: (n, 0, 0)),
        ),
        compiler_params=pltpu.CompilerParams(
            dimension_semantics=("parallel",)),          # multi-TC chips: one block per core
    )(x_rows, m_tiled, m_pool, mw, brow)

    m_out = mo_rows.reshape(N, 1, H, W)
    y_nhwc = y_rows.reshape(N, H, W, Cout)
    if nhwc_out:
        return y_nhwc, m_out                             # skip epilogue transpose (review)
    return jnp.transpose(y_nhwc, (0, 3, 1, 2)), m_out    # NCHW to match PyTorch


def saconv_block(x_nchw, m_nchw, w_oihw, bias, *, nhwc_out=False):
    """SAConvBlock forward. Inputs in PyTorch NCHW convention.

    x_nchw : (N, Cin, H, W) float32
    m_nchw : (N, 1,  H, W) float32 mask
    w_oihw : (Cout, Cin, 3, 3) float32 (PyTorch Conv2d weight layout)
    bias   : (Cout,) float32
    returns (x_out (N, Cout, H, W) [or NHWC if nhwc_out], m_out (N, 1, H, W))
    """
    assert m_nchw.shape[1] == 1
    G = _num_grid_steps(x_nchw.shape[0])
    return _saconv_block_jit(x_nchw, m_nchw, w_oihw, bias,
                             grid_steps=G, nhwc_out=nhwc_out)


def _reference(x_nchw, m_nchw, w_oihw, bias):
    """Pure-JAX reference of the PyTorch forward (for verification)."""
    xm = x_nchw * m_nchw
    y = lax.conv_general_dilated(
        xm, w_oihw, window_strides=(1, 1), padding=((1, 1), (1, 1)),
        dimension_numbers=("NCHW", "OIHW", "NCHW"),
        precision=lax.Precision.HIGHEST)
    y = y + bias.reshape(1, -1, 1, 1)
    y = jnp.maximum(y, 0.0)
    m_out = lax.reduce_window(
        m_nchw, -jnp.inf, lax.max,
        window_dimensions=(1, 1, 3, 3), window_strides=(1, 1, 1, 1),
        padding=((0, 0), (0, 0), (1, 1), (1, 1)))
    return y, m_out


if __name__ == "__main__":
    # Small shapes consistent with the module: N=2, Cin=4, Cout=8, H=W=16, k=3, pad=1.
    N, Cin, Cout, H, W = 2, 4, 8, 16, 16

    key = jax.random.PRNGKey(0)
    kx, km, kw, kb = jax.random.split(key, 4)

    x = jax.random.normal(kx, (N, Cin, H, W), dtype=jnp.float32)
    # sparse binary validity mask with a single channel
    m = (jax.random.uniform(km, (N, 1, H, W)) > 0.5).astype(jnp.float32)

    # conv weight ~ kaiming_normal_(mode='fan_out', nonlinearity='relu');
    # the module initializes bias to zeros, but use a small random bias here so the
    # bias-add path is actually exercised by the correctness check.
    fan_out = Cout * 3 * 3
    w = jax.random.normal(kw, (Cout, Cin, 3, 3), dtype=jnp.float32) * jnp.sqrt(2.0 / fan_out)
    b = 0.1 * jax.random.normal(kb, (Cout,), dtype=jnp.float32)

    x_out, m_out = saconv_block(x, m, w, b)
    jax.block_until_ready((x_out, m_out))

    # sanity check against a pure-JAX reference of the PyTorch semantics
    x_ref, m_ref = _reference(x, m, w, b)
    assert x_out.shape == (N, Cout, H, W) and m_out.shape == (N, 1, H, W)
    assert jnp.allclose(x_out, x_ref, atol=1e-4, rtol=1e-4)
    assert jnp.allclose(m_out, m_ref, atol=1e-6, rtol=0.0)

    print("KERNEL_OK")
</pallas_src>

<mosaic_0001>
module attributes {stable_mosaic.version = 11 : i64} {
  func.func @_saconv_block_kernel(%arg0: i32, %arg1: memref<1x32x64xf32, #tpu.memory_space<vmem>>, %arg2: memref<1x32x64xf32, #tpu.memory_space<vmem>>, %arg3: memref<1x32x128xf32, #tpu.memory_space<vmem>>, %arg4: memref<64x384xf32, #tpu.memory_space<vmem>>, %arg5: memref<1x128xf32, #tpu.memory_space<vmem>>, %arg6: memref<1x32x128xf32, #tpu.memory_space<vmem>>, %arg7: memref<1x32x16xf32, #tpu.memory_space<vmem>>) attributes {dimension_semantics = [#tpu.dimension_semantics<parallel>], iteration_bounds = array<i64: 1>, scalar_prefetch = 0 : i64, scratch_operands = 0 : i64, tpu.core_type = #tpu.core_type<tc>, window_params = [{transform_indices = @transform_0, window_bounds = array<i64: 1, 32, 64>}, {transform_indices = @transform_1, window_bounds = array<i64: 1, 32, 64>}, {transform_indices = @transform_2, window_bounds = array<i64: 1, 32, 128>}, {pipeline_mode = #tpu.pipeline_mode<synchronous>, transform_indices = @transform_3, window_bounds = array<i64: 64, 384>}, {pipeline_mode = #tpu.pipeline_mode<synchronous>, transform_indices = @transform_4, window_bounds = array<i64: 1, 128>}, {transform_indices = @transform_5, window_bounds = array<i64: 1, 32, 128>}, {transform_indices = @transform_6, window_bounds = array<i64: 1, 32, 16>}]} {
    %c0 = arith.constant 0 : index
    %c0_0 = arith.constant 0 : index
    %c0_1 = arith.constant 0 : index
    %0 = vector.load %arg1[%c0, %c0_0, %c0_1] : memref<1x32x64xf32, #tpu.memory_space<vmem>>, vector<1x32x64xf32>
    %1 = vector.shape_cast %0 : vector<1x32x64xf32> to vector<32x64xf32>
    %c0_2 = arith.constant 0 : index
    %c0_3 = arith.constant 0 : index
    %c0_4 = arith.constant 0 : index
    %2 = vector.load %arg2[%c0_2, %c0_3, %c0_4] : memref<1x32x64xf32, #tpu.memory_space<vmem>>, vector<1x32x64xf32>
    %3 = vector.shape_cast %2 : vector<1x32x64xf32> to vector<32x64xf32>
    %4 = arith.mulf %1, %3 : vector<32x64xf32>
    %c0_5 = arith.constant 0 : index
    %c0_6 = arith.constant 0 : index
    %5 = vector.load %arg4[%c0_5, %c0_6] : memref<64x384xf32, #tpu.memory_space<vmem>>, vector<64x384xf32>
    %cst = arith.constant dense<0.000000e+00> : vector<32x384xf32>
    %6 = tpu.matmul %4, %5, %cst {dimension_numbers = #tpu.dot_dimension_numbers<[1], [0], [0], [1], [0, 0, 1, 1], [], []>, precision = #tpu.contract_precision<fp32>} : vector<32x64xf32>, vector<64x384xf32>, vector<32x384xf32> -> vector<32x384xf32>
    %7 = vector.extract_strided_slice %6 {offsets = [0, 0], sizes = [32, 128], strides = [1, 1]} : vector<32x384xf32> to vector<32x128xf32>
    %8 = vector.extract_strided_slice %6 {offsets = [0, 128], sizes = [32, 128], strides = [1, 1]} : vector<32x384xf32> to vector<32x128xf32>
    %9 = vector.extract_strided_slice %6 {offsets = [0, 256], sizes = [32, 128], strides = [1, 1]} : vector<32x384xf32> to vector<32x128xf32>
    %10 = tpu.iota {dimensions = array<i32: 0>} : vector<32x128xi32>
    %c15_i32 = arith.constant 15 : i32
    %11 = vector.broadcast %c15_i32 : i32 to vector<32x128xi32>
    %12 = arith.andi %10, %11 : vector<32x128xi32>
    %c0_i32 = arith.constant 0 : i32
    %13 = vector.broadcast %c0_i32 : i32 to vector<32x128xi32>
    %14 = arith.cmpi eq, %12, %13 : vector<32x128xi32>
    %c1_i32 = arith.constant 1 : i32
    %15 = tpu.dynamic_rotate %7 by %c1_i32 dim 0 : vector<32x128xf32>, i32 -> vector<32x128xf32>
    %cst_7 = arith.constant 0.000000e+00 : f32
    %16 = vector.broadcast %cst_7 : f32 to vector<32x128xf32>
    %17 = arith.select %14, %16, %15 : vector<32x128xi1>, vector<32x128xf32>
    %c15_i32_8 = arith.constant 15 : i32
    %18 = vector.broadcast %c15_i32_8 : i32 to vector<32x128xi32>
    %19 = arith.cmpi eq, %12, %18 : vector<32x128xi32>
    %c31_i32 = arith.constant 31 : i32
    %20 = tpu.dynamic_rotate %9 by %c31_i32 dim 0 : vector<32x128xf32>, i32 -> vector<32x128xf32>
    %cst_9 = arith.constant 0.000000e+00 : f32
    %21 = vector.broadcast %cst_9 : f32 to vector<32x128xf32>
    %22 = arith.select %19, %21, %20 : vector<32x128xi1>, vector<32x128xf32>
    %23 = arith.addf %8, %17 : vector<32x128xf32>
    %24 = arith.addf %23, %22 : vector<32x128xf32>
    %c0_10 = arith.constant 0 : index
    %c0_11 = arith.constant 0 : index
    %25 = vector.load %arg5[%c0_10, %c0_11] : memref<1x128xf32, #tpu.memory_space<vmem>>, vector<1x128xf32>
    %26 = vector.broadcast %25 : vector<1x128xf32> to vector<32x128xf32>
    %27 = arith.addf %24, %26 : vector<32x128xf32>
    %cst_12 = arith.constant 0.000000e+00 : f32
    %28 = vector.broadcast %cst_12 : f32 to vector<32x128xf32>
    %29 = arith.maximumf %27, %28 : vector<32x128xf32>
    %c0_13 = arith.constant 0 : index
    %c0_14 = arith.constant 0 : index
    %c0_15 = arith.constant 0 : index
    %30 = vector.load %arg6[%c0_13, %c0_14, %c0_15] : memref<1x32x128xf32, #tpu.memory_space<vmem>>, vector<1x32x128xf32>
    %31 = vector.shape_cast %30 : vector<1x32x128xf32> to vector<32x128xf32>
    %32 = vector.shape_cast %29 : vector<32x128xf32> to vector<1x32x128xf32>
    tpu.vector_store %arg6[%c0_13, %c0_14, %c0_15], %32 {strides = array<i32>} : memref<1x32x128xf32, #tpu.memory_space<vmem>>, vector<1x32x128xf32>,
    %c0_16 = arith.constant 0 : index
    %c0_17 = arith.constant 0 : index
    %c0_18 = arith.constant 0 : index
    %33 = vector.load %arg3[%c0_16, %c0_17, %c0_18] : memref<1x32x128xf32, #tpu.memory_space<vmem>>, vector<1x32x128xf32>
    %34 = vector.shape_cast %33 : vector<1x32x128xf32> to vector<32x128xf32>
    %35 = tpu.iota {dimensions = array<i32: 1>} : vector<32x128xi32>
    %c0_i32_19 = arith.constant 0 : i32
    %36 = vector.broadcast %c0_i32_19 : i32 to vector<32x128xi32>
    %37 = arith.cmpi eq, %35, %36 : vector<32x128xi32>
    %c1_i32_20 = arith.constant 1 : i32
    %38 = tpu.dynamic_rotate %34 by %c1_i32_20 dim 1 : vector<32x128xf32>, i32 -> vector<32x128xf32>
    %cst_21 = arith.constant 0xFF800000 : f32
    %39 = vector.broadcast %cst_21 : f32 to vector<32x128xf32>
    %40 = arith.select %37, %39, %38 : vector<32x128xi1>, vector<32x128xf32>
    %c15_i32_22 = arith.constant 15 : i32
    %41 = vector.broadcast %c15_i32_22 : i32 to vector<32x128xi32>
    %42 = arith.cmpi eq, %35, %41 : vector<32x128xi32>
    %c127_i32 = arith.constant 127 : i32
    %43 = tpu.dynamic_rotate %34 by %c127_i32 dim 1 : vector<32x128xf32>, i32 -> vector<32x128xf32>
    %cst_23 = arith.constant 0xFF800000 : f32
    %44 = vector.broadcast %cst_23 : f32 to vector<32x128xf32>
    %45 = arith.select %42, %44, %43 : vector<32x128xi1>, vector<32x128xf32>
    %46 = arith.maximumf %40, %45 : vector<32x128xf32>
    %47 = arith.maximumf %34, %46 : vector<32x128xf32>
    %48 = tpu.iota {dimensions = array<i32: 0>} : vector<32x128xi32>
    %c15_i32_24 = arith.constant 15 : i32
    %49 = vector.broadcast %c15_i32_24 : i32 to vector<32x128xi32>
    %50 = arith.andi %48, %49 : vector<32x128xi32>
    %c0_i32_25 = arith.constant 0 : i32
    %51 = vector.broadcast %c0_i32_25 : i32 to vector<32x128xi32>
    %52 = arith.cmpi eq, %50, %51 : vector<32x128xi32>
    %c1_i32_26 = arith.constant 1 : i32
    %53 = tpu.dynamic_rotate %47 by %c1_i32_26 dim 0 : vector<32x128xf32>, i32 -> vector<32x128xf32>
    %cst_27 = arith.constant 0xFF800000 : f32
    %54 = vector.broadcast %cst_27 : f32 to vector<32x128xf32>
    %55 = arith.select %52, %54, %53 : vector<32x128xi1>, vector<32x128xf32>
    %c15_i32_28 = arith.constant 15 : i32
    %56 = vector.broadcast %c15_i32_28 : i32 to vector<32x128xi32>
    %57 = arith.cmpi eq, %50, %56 : vector<32x128xi32>
    %c31_i32_29 = arith.constant 31 : i32
    %58 = tpu.dynamic_rotate %47 by %c31_i32_29 dim 0 : vector<32x128xf32>, i32 -> vector<32x128xf32>
    %cst_30 = arith.constant 0xFF800000 : f32
    %59 = vector.broadcast %cst_30 : f32 to vector<32x128xf32>
    %60 = arith.select %57, %59, %58 : vector<32x128xi1>, vector<32x128xf32>
    %61 = arith.maximumf %55, %60 : vector<32x128xf32>
    %62 = arith.maximumf %47, %61 : vector<32x128xf32>
    %63 = vector.extract_strided_slice %62 {offsets = [0, 0], sizes = [32, 16], strides = [1, 1]} : vector<32x128xf32> to vector<32x16xf32>
    %c0_31 = arith.constant 0 : index
    %c0_32 = arith.constant 0 : index
    %c0_33 = arith.constant 0 : index
    %64 = vector.load %arg7[%c0_31, %c0_32, %c0_33] : memref<1x32x16xf32, #tpu.memory_space<vmem>>, vector<1x32x16xf32>
    %65 = vector.shape_cast %64 : vector<1x32x16xf32> to vector<32x16xf32>
    %66 = vector.shape_cast %63 : vector<32x16xf32> to vector<1x32x16xf32>
    tpu.vector_store %arg7[%c0_31, %c0_32, %c0_33], %66 {strides = array<i32>} : memref<1x32x16xf32, #tpu.memory_space<vmem>>, vector<1x32x16xf32>,
    return
  }
  func.func @transform_0(%arg0: i32) -> (i32, i32, i32) {
    %c0_i32 = arith.constant 0 : i32
    %c0_i32_0 = arith.constant 0 : i32
    %c0_i32_1 = arith.constant 0 : i32
    return %arg0, %c0_i32, %c0_i32_0 : i32, i32, i32
  }
  func.func @transform_1(%arg0: i32) -> (i32, i32, i32) {
    %c0_i32 = arith.constant 0 : i32
    %c0_i32_0 = arith.constant 0 : i32
    %c0_i32_1 = arith.constant 0 : i32
    return %arg0, %c0_i32, %c0_i32_0 : i32, i32, i32
  }
  func.func @transform_2(%arg0: i32) -> (i32, i32, i32) {
    %c0_i32 = arith.constant 0 : i32
    %c0_i32_0 = arith.constant 0 : i32
    %c0_i32_1 = arith.constant 0 : i32
    return %arg0, %c0_i32, %c0_i32_0 : i32, i32, i32
  }
  func.func @transform_3(%arg0: i32) -> (i32, i32) {
    %c0_i32 = arith.constant 0 : i32
    %c0_i32_0 = arith.constant 0 : i32
    %c0_i32_1 = arith.constant 0 : i32
    return %c0_i32, %c0_i32_0 : i32, i32
  }
  func.func @transform_4(%arg0: i32) -> (i32, i32) {
    %c0_i32 = arith.constant 0 : i32
    %c0_i32_0 = arith.constant 0 : i32
    %c0_i32_1 = arith.constant 0 : i32
    return %c0_i32, %c0_i32_0 : i32, i32
  }
  func.func @transform_5(%arg0: i32) -> (i32, i32, i32) {
    %c0_i32 = arith.constant 0 : i32
    %c0_i32_0 = arith.constant 0 : i32
    %c0_i32_1 = arith.constant 0 : i32
    return %arg0, %c0_i32, %c0_i32_0 : i32, i32, i32
  }
  func.func @transform_6(%arg0: i32) -> (i32, i32, i32) {
    %c0_i32 = arith.constant 0 : i32
    %c0_i32_0 = arith.constant 0 : i32
    %c0_i32_1 = arith.constant 0 : i32
    return %arg0, %c0_i32, %c0_i32_0 : i32, i32, i32
  }
}

</mosaic_0001>

<bundles_post_ra>
// kernel: tile.16
= control target key start
LH: loop header
LB: loop body
LE: loop exit
PB: predicated region body
PF: predicated region fallthrough
CT: control target
= control target key end

     0   :  { %s28_s0 = inlined_call_operand.vmem [shape: f32[8], index: 0, kind: input, shape index: {}]   ;;  %s29_s1 = inlined_call_operand.vmem [shape: f32[16,8], index: 1, kind: output, shape index: {}]  }
   0x1   :  { %v4_v0 = vld [vmem:[%s28_s0] ss:$0 sm:$0xff] }
   0x2   :  { %5 = vst [vmem:[%s29_s1] sm:$0xff] %v4_v0  ;;  %8 = vst [vmem:[%s29_s1 + $0x8] sm:$0xff] %v4_v0 }

// kernel: tile.17
= control target key start
LH: loop header
LB: loop body
LE: loop exit
PB: predicated region body
PF: predicated region fallthrough
CT: control target
= control target key end

     0   :  { %s131_s10 = smov 120   ;;  %s132_s11 = smov 104   ;;  %vm3_vm0 = vcmask 64512   ;;  %vm9_vm1 = vcmask 1048512   ;;  %vm15_vm2 = vcmask 982912   ;;  %vm21_vm3 = vcmask 917312   ;;  %s207_s0 = inlined_call_operand.vmem [shape: f32[16,8], index: 0, kind: input, shape index: {}]   ;;  %s208_s1 = inlined_call_operand.vmem [shape: f32[1,128], index: 1, kind: output, shape index: {}]  }
   0x1   :  { %v101_v0 = vld [vmem:[%s207_s0 + $0xf] sm:$0x1]   ;;  %v103_v1 = vld [vmem:[%s207_s0 + $0xd] sm:$0x1]   ;;  %v102_v2 = vld [vmem:[%s207_s0 + $0xe] sm:$0x1]  }
   0x2   :  { %7 = vrot.lane.b32.xlu0 %v101_v0, %s131_s10  ;;  %19 = vrot.lane.b32.xlu1 %v103_v1, %s132_s11  ;;  %v104_v3 = vld [vmem:[%s207_s0 + $0xc] sm:$0x1]   ;;  %s133_s16 = smov 112   ;;  %s134_s17 = smov 96   ;;  %v105_v4 = vld [vmem:[%s207_s0 + $0xb] sm:$0x1]  }
   0x3   :  { %v106_v5 = vld [vmem:[%s207_s0 + $0xa] sm:$0x1]   ;;  %v2_v6 = vld [vmem:[%s207_s0] sm:$0x1]   ;;  %s135_s24 = smov 88   ;;  %s136_s25 = smov 80  }
   0x4   :  { %4 = vst.msk [vmem:[#allocation0] sm:$0x1] %vm3_vm0, %v2_v6   ;;  %v107_v7 = vld [vmem:[%s207_s0 + $0x9] sm:$0x1]   ;;  %v108_v8 = vld [vmem:[%s207_s0 + $0x8] sm:$0x1]  }
   0x5   :  { %s137_s30 = smov 72   ;;  %s138_s2 = smov 64   ;;  %v109_v9 = vld [vmem:[%s207_s0 + $0x7] sm:$0x1]   ;;  %v110_v10 = vld [vmem:[%s207_s0 + $0x6] sm:$0x1]  }
   0x6   :  { %13 = vrot.lane.b32.xlu0 %v102_v2, %s133_s16  ;;  %25 = vrot.lane.b32.xlu1 %v104_v3, %s134_s17  ;;  %s139_s7 = smov 56   ;;  %s140_s8 = smov 48   ;;  %v111_v11 = vld [vmem:[%s207_s0 + $0x5] sm:$0x1]   ;;  %v112_v12 = vld [vmem:[%s207_s0 + $0x4] sm:$0x1]  }
   0x7   :  { %s141_s13 = smov 40   ;;  %s142_s14 = smov 32   ;;  %v113_v13 = vld [vmem:[%s207_s0 + $0x3] sm:$0x1]   ;;  %v114_v14 = vld [vmem:[%s207_s0 + $0x2] sm:$0x1]  }
   0x8   :  { %s143_s19 = smov 24   ;;  %s144_s20 = smov 16   ;;  %v115_v15 = vld [vmem:[%s207_s0 + $0x1] sm:$0x1]   ;;  %vm27_vm4 = vcmask 851712   ;;  %vm33_vm5 = vcmask 786112  }
   0x9   :  { %s145_s0 = smov 8   ;;  %vm39_vm6 = vcmask 720512   ;;  %vm45_vm7 = vcmask 654912   ;;  %vm51_vm8 = vcmask 589312   ;;  %vm57_vm9 = vcmask 523712  }
   0xa   :  { %31 = vrot.lane.b32.xlu0 %v105_v4, %s135_s24  ;;  %37 = vrot.lane.b32.xlu1 %v106_v5, %s136_s25  ;;  %vm63_vm10 = vcmask 458112   ;;  %vm69_vm11 = vcmask 392512   ;;  %vm75_vm12 = vcmask 326912   ;;  %vm81_vm13 = vcmask 261312  }
   0xb   :  { %vm87_vm14 = vcmask 195712   ;;  %vm93_vm15 = vcmask 130112  }
   0xe   :  { %43 = vrot.lane.b32.xlu0 %v107_v7, %s137_s30  ;;  %49 = vrot.lane.b32.xlu1 %v108_v8, %s138_s2 }
  0x12   :  { %55 = vrot.lane.b32.xlu0 %v109_v9, %s139_s7  ;;  %61 = vrot.lane.b32.xlu1 %v110_v10, %s140_s8 }
  0x16   :  { %67 = vrot.lane.b32.xlu0 %v111_v11, %s141_s13  ;;  %73 = vrot.lane.b32.xlu1 %v112_v12, %s142_s14 }
  0x1a   :  { %79 = vrot.lane.b32.xlu0 %v113_v13, %s143_s19  ;;  %85 = vrot.lane.b32.xlu1 %v114_v14, %s144_s20 }
  0x1e   :  { %91 = vrot.lane.b32.xlu0 %v115_v15, %s145_s0 }
  0x74   :  { %v8_v16 = vpop.permute.xlu0 %7   ;;  %v20_v17 = vpop.permute.xlu1 %19  }
  0x75   :  { %10 = vst.msk [vmem:[#allocation0] sm:$0x1] %vm9_vm1, %v8_v16  }
  0x78   :  { %v14_v18 = vpop.permute.xlu0 %13   ;;  %v26_v19 = vpop.permute.xlu1 %25  }
  0x79   :  { %16 = vst.msk [vmem:[#allocation0] sm:$0x1] %vm15_vm2, %v14_v18  }
  0x7a   :  { %22 = vst.msk [vmem:[#allocation0] sm:$0x1] %vm21_vm3, %v20_v17  }
  0x7b   :  { %28 = vst.msk [vmem:[#allocation0] sm:$0x1] %vm27_vm4, %v26_v19  }
  0x7c   :  { %v32_v20 = vpop.permute.xlu0 %31   ;;  %v38_v21 = vpop.permute.xlu1 %37  }
  0x7d   :  { %34 = vst.msk [vmem:[#allocation0] sm:$0x1] %vm33_vm5, %v32_v20  }
  0x7e   :  { %40 = vst.msk [vmem:[#allocation0] sm:$0x1] %vm39_vm6, %v38_v21  }
  0x80   :  { %v44_v22 = vpop.permute.xlu0 %43   ;;  %v50_v23 = vpop.permute.xlu1 %49  }
  0x81   :  { %46 = vst.msk [vmem:[#allocation0] sm:$0x1] %vm45_vm7, %v44_v22  }
  0x82   :  { %52 = vst.msk [vmem:[#allocation0] sm:$0x1] %vm51_vm8, %v50_v23  }
  0x84   :  { %v56_v24 = vpop.permute.xlu0 %55   ;;  %v62_v25 = vpop.permute.xlu1 %61  }
  0x85   :  { %58 = vst.msk [vmem:[#allocation0] sm:$0x1] %vm57_vm9, %v56_v24  }
  0x86   :  { %64 = vst.msk [vmem:[#allocation0] sm:$0x1] %vm63_vm10, %v62_v25  }
  0x88   :  { %v68_v26 = vpop.permute.xlu0 %67   ;;  %v74_v27 = vpop.permute.xlu1 %73  }
  0x89   :  { %70 = vst.msk [vmem:[#allocation0] sm:$0x1] %vm69_vm11, %v68_v26  }
  0x8a   :  { %76 = vst.msk [vmem:[#allocation0] sm:$0x1] %vm75_vm12, %v74_v27  }
  0x8c   :  { %v80_v28 = vpop.permute.xlu0 %79   ;;  %v86_v29 = vpop.permute.xlu1 %85  }
  0x8d   :  { %82 = vst.msk [vmem:[#allocation0] sm:$0x1] %vm81_vm13, %v80_v28  }
  0x8e   :  { %88 = vst.msk [vmem:[#allocation0] sm:$0x1] %vm87_vm14, %v86_v29  }
  0x90   :  { %v92_v30 = vpop.permute.xlu0 %91  }
  0x91   :  { %94 = vst.msk [vmem:[#allocation0] sm:$0x1] %vm93_vm15, %v92_v30  }
  0x98   :  { %v98_v31 = vld [vmem:[#allocation0] sm:$0x1] }
  0x99   :  { %100 = vst [vmem:[%s208_s1] sm:$0x1] %v98_v31 }

// kernel: _saconv_block_jit.1
= control target key start
LH: loop header
LB: loop body
LE: loop exit
PB: predicated region body
PF: predicated region fallthrough
CT: control target
= control target key end

     0   :  { %v2948_v9 = vmov 0.0   ;;  %vm59_vm0 = vcmask 523264   ;;  %s2187_s28 = smov 1   ;;  %s2921_s0 = inlined_call_operand.vmem [shape: f32[1,32,64], index: 0, kind: input, shape index: {}]   ;;  %s2922_s1 = inlined_call_operand.vmem [shape: f32[1,32,64], index: 1, kind: input, shape index: {}]   ;;  %s2923_s2 = inlined_call_operand.vmem [shape: f32[1,32,128], index: 2, kind: input, shape index: {}]   ;;  %s2924_s3 = inlined_call_operand.vmem [shape: f32[64,384], index: 3, kind: input, shape index: {}]   ;;  %s2925_s4 = inlined_call_operand.vmem [shape: f32[1,128], index: 4, kind: input, shape index: {}]   ;;  %s2926_s5 = inlined_call_operand.vmem [shape: f32[1,32,128], index: 5, kind: output, shape index: {0}]   ;;  %s2927_s6 = inlined_call_operand.hbm [shape: f32[1,32,16], index: 6, kind: output, shape index: {1}]  }
   0x1   :  { %v36_v0 = vld [vmem:[%s2924_s3 + $0x8] sm:$0xff]  ;;  %v39_v1 = vld [vmem:[%s2924_s3 + $0x20] sm:$0xff]  ;;  %v2236_v2 = vld [vmem:[%s2924_s3 + $0x10] sm:$0xff]  ;;  %152 = vmatprep.mubr.f32.mxu0 %v2948_v9 }
   0x2   :  { %v72_v3 = vand.u32 4294901760, %v36_v0  ;;  %v76_v4 = vand.u32 4294901760, %v39_v1  ;;  %v2241_v5 = vld [vmem:[%s2924_s3 + $0x28] sm:$0xff]  ;;  %v867_v6 = vand.u32 4294901760, %v2236_v2  ;;  %v35_v7 = vld [vmem:[%s2924_s3] sm:$0xff]  ;;  %v38_v8 = vld [vmem:[%s2924_s3 + $0x18] sm:$0xff] }
   0x3   :  { %v870_v10 = vand.u32 4294901760, %v2241_v5  ;;  %v74_v11 = vand.u32 4294901760, %v35_v7  ;;  %v78_v12 = vand.u32 4294901760, %v38_v8  ;;  %v42_v13 = vld [vmem:[%s2924_s3 + $0x38] sm:$0xff]  ;;  %v45_v14 = vld [vmem:[%s2924_s3 + $0x50] sm:$0xff]  ;;  %v2261_v15 = vld [vmem:[%s2924_s3 + $0x40] sm:$0xff] }
   0x4   :  { %v2263_v16 = vpack.c.bf16 %v76_v4, %v72_v3  ;;  %v2265_v17 = vsub.f32 %v36_v0, %v72_v3  ;;  %v2267_v18 = vsub.f32 %v39_v1, %v76_v4  ;;  %v80_v19 = vand.u32 4294901760, %v42_v13  ;;  %v2272_v20 = vld [vmem:[%s2924_s3 + $0x58] sm:$0xff]  ;;  %v41_v21 = vld [vmem:[%s2924_s3 + $0x30] sm:$0xff]  ;;  %v44_v22 = vld [vmem:[%s2924_s3 + $0x48] sm:$0xff] }
   0x5   :  { %v2284_v23 = vpack.c.bf16 %v870_v10, %v867_v6  ;;  %v2286_v24 = vpack.c.bf16 %v78_v12, %v74_v11  ;;  %v2288_v25 = vsub.f32 %v35_v7, %v74_v11  ;;  %v2290_v26 = vsub.f32 %v38_v8, %v78_v12  ;;  %v48_v27 = vld [vmem:[%s2924_s3 + $0x68] sm:$0xff]  ;;  %v51_v28 = vld [vmem:[%s2924_s3 + $0x80] sm:$0xff]  ;;  %v2301_v29 = vld [vmem:[%s2924_s3 + $0x70] sm:$0xff] }
   0x6   :  { %1905 = vmatprep.subr.bf16.mxu0 %v2263_v16  ;;  %v84_v30 = vand.u32 4294901760, %v45_v14  ;;  %v2304_v31 = vsub.f32 %v42_v13, %v80_v19  ;;  %v873_v32 = vand.u32 4294901760, %v2261_v15  ;;  %v876_v33 = vand.u32 4294901760, %v2272_v20  ;;  %v2311_v34 = vld [vmem:[%s2924_s3 + $0x88] sm:$0xff]  ;;  %v47_v39 = vld [vmem:[%s2924_s3 + $0x60] sm:$0xff]  ;;  %v50_v40 = vld [vmem:[%s2924_s3 + $0x78] sm:$0xff] }
   0x7   :  { %2001 = vmatprep.subr.bf16.mxu1 %v2284_v23  ;;  %1907 = vmatpush1.bf16.msra.mxu0 %v2286_v24  ;;  %v82_v35 = vand.u32 4294901760, %v41_v21  ;;  %v86_v36 = vand.u32 4294901760, %v44_v22  ;;  %v88_v37 = vand.u32 4294901760, %v48_v27  ;;  %v92_v38 = vand.u32 4294901760, %v51_v28  ;;  %v54_v45 = vld [vmem:[%s2924_s3 + $0x98] sm:$0xff]  ;;  %v57_v46 = vld [vmem:[%s2924_s3 + $0xb0] sm:$0xff] }
   0x8   :  { %2003 = vmatpush3.bf16.msra.mxu1 %v2284_v23  ;;  %v2322_v41 = vpack.c.bf16 %v84_v30, %v80_v19  ;;  %v2324_v42 = vsub.f32 %v45_v14, %v84_v30  ;;  %v2330_v43 = vpack.c.bf16 %v876_v33, %v873_v32  ;;  %v2939_v44 = vand.u32 4294901760, %v2301_v29  ;;  %v2342_v47 = vld [vmem:[%s2924_s3 + $0xa0] sm:$0xff]  ;;  %v2355_v52 = vld [vmem:[%s2924_s3 + $0xb8] sm:$0xff]  ;;  %v53_v53 = vld [vmem:[%s2924_s3 + $0x90] sm:$0xff] }
   0x9   :  { %v2344_v48 = vpack.c.bf16 %v86_v36, %v82_v35  ;;  %v2346_v49 = vsub.f32 %v41_v21, %v82_v35  ;;  %v2348_v50 = vsub.f32 %v44_v22, %v86_v36  ;;  %v2350_v51 = vpack.c.bf16 %v92_v38, %v88_v37  ;;  %v56_v62 = vld [vmem:[%s2924_s3 + $0xa8] sm:$0xff]  ;;  %v23_v63 = vld [vmem:[%s2921_s0] sm:$0xff]  ;;  %v2392_v8 = vld [vmem:[%s2923_s2 + $0x10] sm:$0xff] }
   0xa   :  { %1909 = vmatprep.subr.bf16.mxu0 %v2322_v41  ;;  %2005 = vmatprep.subr.bf16.mxu1 %v2330_v43  ;;  %v2362_v54 = vsub.f32 %v48_v27, %v88_v37  ;;  %v2364_v55 = vsub.f32 %v51_v28, %v92_v38  ;;  %v2938_v56 = vand.u32 4294901760, %v2311_v34  ;;  %v90_v57 = vand.u32 4294901760, %v47_v39  ;;  %v27_v7 = vld [vmem:[%s2922_s1] sm:$0xff]  ;;  %2968 = vst [vmem:[#allocation5_spill] sm:$0xff] %v2392_v8 }
   0xb   :  { %1911 = vmatpush1.bf16.msra.mxu0 %v2344_v48  ;;  %v94_v58 = vand.u32 4294901760, %v50_v40  ;;  %v96_v59 = vand.u32 4294901760, %v54_v45  ;;  %v100_v60 = vand.u32 4294901760, %v57_v46  ;;  %v2932_v61 = vand.u32 4294901760, %v2342_v47  ;;  %v2397_v11 = vld [vmem:[%s2923_s2] sm:$0xff]  ;;  %1613 = vrot.lane.b32.xlu1 %v2392_v8, %s2187_s28 }
   0xc   :  { %2007 = vmatpush3.bf16.msra.mxu1 %v2330_v43  ;;  %1913 = vmatprep.subr.bf16.mxu0 %v2350_v51  ;;  %v2381_v0 = vpack.c.bf16 %v2938_v56, %v2939_v44  ;;  %v2383_v1 = vsub.f32 %v47_v39, %v90_v57  ;;  %v2931_v3 = vand.u32 4294901760, %v2355_v52  ;;  %v98_v4 = vand.u32 4294901760, %v53_v53  ;;  %2969 = vst [vmem:[#allocation6_spill] sm:$0xff] %v2397_v11 }
   0xd   :  { %v2399_v12 = vpack.c.bf16 %v94_v58, %v90_v57  ;;  %v2401_v13 = vsub.f32 %v50_v40, %v94_v58  ;;  %v2403_v14 = vpack.c.bf16 %v100_v60, %v96_v59  ;;  %v2405_v19 = vsub.f32 %v54_v45, %v96_v59 }
   0xe   :  { %12 = vsyncpa [#allocation3], 0  ;;  %2009 = vmatprep.subr.bf16.mxu1 %v2381_v0  ;;  %v2410_v21 = vsub.f32 %v57_v46, %v100_v60  ;;  %v2416_v22 = vpack.c.bf16 %v2931_v3, %v2932_v61  ;;  %v102_v27 = vand.u32 4294901760, %v56_v62  ;;  %v2418_v28 = vsub.f32 %v53_v53, %v98_v4  ;;  %1609 = vrot.lane.b32.xlu0 %v2397_v11, %s2187_s28  ;;  %v2425_v30 = vld [vmem:[%s2923_s2 + $0x18] sm:$0xff]  ;;  %v2438_v39 = vld [vmem:[%s2923_s2 + $0x8] sm:$0xff]  ;;  %s2188_s12 = smov 127  }
   0xf   :  { %2971 = vst [vmem:[#allocation8_spill] sm:$0xff] %v2425_v30  ;;  %1915 = vmatpush1.bf16.msra.mxu0 %v2399_v12  ;;  %v31_v35 = vmul.f32 %v27_v7, %v23_v63  ;;  %v2930_v36 = vand.u32 4294901760, %v2265_v17  ;;  %v2928_v37 = vand.u32 4294901760, %v2267_v18  ;;  %v2433_v38 = vsub.f32 %v2236_v2, %v867_v6  ;;  %2972 = vst [vmem:[#allocation9_spill] sm:$0xff] %v2438_v39  ;;  %v24_v6 = vld [vmem:[%s2921_s0 + $0x8] sm:$0xff] }
  0x10   :  { %2970 = vst [vmem:[#allocation7_spill] sm:$0xff] %v2416_v22  ;;  %2011 = vmatpush3.bf16.msra.mxu1 %v2381_v0  ;;  %1917 = vmatprep.subr.bf16.mxu0 %v2403_v14  ;;  %v2442_v40 = vpack.c.bf16 %v102_v27, %v98_v4  ;;  %v2444_v45 = vsub.f32 %v56_v62, %v102_v27  ;;  %v2929_v2 = vand.u32 4294901760, %v2288_v25  ;;  %v28_v53 = vld [vmem:[%s2922_s1 + $0x8] sm:$0xff]  ;;  %v2937_v63 = vand.u32 4294901760, %v2290_v26 }
  0x11   :  { %v2449_v46 = vsub.f32 %v2241_v5, %v870_v10  ;;  %2013 = vmatprep.subr.bf16.mxu1 %v2416_v22  ;;  %v61_v57 = vsel %vm59_vm0, %v31_v35, 0  ;;  %v200_v58 = vsub.f32 %v2265_v17, %v2930_v36  ;;  %v212_v5 = vsub.f32 %v2267_v18, %v2928_v37  ;;  %1615 = vrot.lane.b32.xlu1 %v2425_v30, %s2187_s28 }
  0x12   :  { %2973 = vst [vmem:[#allocation10_spill] sm:$0xff] %v2442_v40  ;;  %v2933_v10 = vand.u32 4294901760, %v2433_v38  ;;  %v2469_v59 = vand.u32 4294901760, %v61_v57  ;;  %v206_v62 = vsub.f32 %v2288_v25, %v2929_v2  ;;  %1611 = vrot.lane.b32.xlu0 %v2438_v39, %s2187_s28  ;;  %v32_v35 = vmul.f32 %v28_v53, %v24_v6 }
  0x13   :  { %v2934_v60 = vand.u32 4294901760, %v2449_v46  ;;  %1919 = vmatpush1.bf16.msra.mxu0 %v2442_v40  ;;  %v201_v4 = vand.u32 4294901760, %v200_v58  ;;  %v213_v7 = vand.u32 4294901760, %v212_v5  ;;  %v218_v58 = vsub.f32 %v2290_v26, %v2937_v63 }
  0x14   :  { %v983_v27 = vsub.f32 %v2433_v38, %v2933_v10  ;;  %2015 = vmatpush3.bf16.msra.mxu1 %v2416_v22  ;;  %v2484_v37 = vsub.f32 %v61_v57, %v2469_v59  ;;  %v207_v36 = vand.u32 4294901760, %v206_v62  ;;  %v64_v61 = vsel %vm59_vm0, %v32_v35, 0 }
  0x15   :  { %v990_v2 = vsub.f32 %v2449_v46, %v2934_v60  ;;  %v1920_v5 = vpack.c.bf16 %v213_v7, %v201_v4  ;;  %v2935_v6 = vand.u32 4294901760, %v2304_v31  ;;  %1624 = vrot.lane.b32.xlu1 %v2438_v39, %s2188_s12  ;;  %v219_v10 = vand.u32 4294901760, %v218_v58 }
  0x16   :  { %v984_v3 = vand.u32 4294901760, %v983_v27  ;;  %v2496_v53 = vand.u32 4294901760, %v2484_v37  ;;  %v2498_v60 = vand.u32 4294901760, %v64_v61  ;;  %1622 = vrot.lane.b32.xlu0 %v2397_v11, %s2188_s12  ;;  %v2936_v4 = vand.u32 4294901760, %v2324_v42 }
  0x17   :  { %v991_v57 = vand.u32 4294901760, %v990_v2  ;;  %1921 = vmatprep.subr.bf16.mxu0 %v1920_v5  ;;  %v224_v62 = vsub.f32 %v2304_v31, %v2935_v6  ;;  %v2508_v7 = vsub.f32 %v2261_v15, %v873_v32  ;;  %v2513_v2 = vsub.f32 %v2272_v20, %v876_v33  ;;  %v25_v6 = vld [vmem:[%s2921_s0 + $0x10] sm:$0xff] }
  0x18   :  { %v156_v27 = vsub.f32 %v2484_v37, %v2496_v53  ;;  %v1922_v58 = vpack.c.bf16 %v219_v10, %v207_v36  ;;  %v2518_v5 = vsub.f32 %v64_v61, %v2498_v60  ;;  %v29_v15 = vld [vmem:[%s2922_s1 + $0x10] sm:$0xff]  ;;  %v236_v20 = vsub.f32 %v2324_v42, %v2936_v4 }
  0x19   :  { %v2016_v35 = vpack.c.bf16 %v991_v57, %v984_v3  ;;  %v225_v32 = vand.u32 4294901760, %v224_v62  ;;  %v2940_v33 = vand.u32 4294901760, %v2508_v7  ;;  %v2941_v3 = vand.u32 4294901760, %v2513_v2  ;;  %1628 = vrot.lane.b32.xlu1 %v2425_v30, %s2188_s12 }
  0x1a   :  { %v157_v61 = vand.u32 4294901760, %v156_v27  ;;  %v2533_v36 = vand.u32 4294901760, %v2518_v5  ;;  %v2946_v10 = vand.u32 4294901760, %v2346_v49  ;;  %v2947_v57 = vand.u32 4294901760, %v2348_v50  ;;  %1626 = vrot.lane.b32.xlu0 %v2392_v8, %s2188_s12 }
  0x1b   :  { %2017 = vmatprep.subr.bf16.mxu1 %v2016_v35  ;;  %v237_v62 = vand.u32 4294901760, %v236_v20  ;;  %v997_v4 = vsub.f32 %v2508_v7, %v2940_v33  ;;  %v1004_v63 = vsub.f32 %v2513_v2, %v2941_v3  ;;  %v33_v27 = vmul.f32 %v29_v15, %v25_v6 }
  0x1c   :  { %2974 = vst [vmem:[#allocation11_spill] sm:$0xff] %v2533_v36  ;;  %158 = vmatmul.mubr.f32.vlgmr.msra.gmra.mrb[0].mxu0 %v157_v61  ;;  %1788 = vmatprep.mubr.f32.mxu1 %v157_v61  ;;  %v167_v56 = vsub.f32 %v2518_v5, %v2533_v36  ;;  %v230_v44 = vsub.f32 %v2346_v49, %v2946_v10  ;;  %v2953_v33 = vand.u32 4294901760, %v2362_v54  ;;  %vm1674_vm8 = vcmask 130048  }
  0x1d   :  { %v242_v20 = vsub.f32 %v2348_v50, %v2947_v57  ;;  %1923 = vmatpush1.bf16.msra.mxu0 %v1922_v58  ;;  %163 = vmatprep.mubr.f32.mxu0 %v2948_v9  ;;  %v1924_v3 = vpack.c.bf16 %v237_v62, %v225_v32  ;;  %v998_v6 = vand.u32 4294901760, %v997_v4  ;;  %v1005_v15 = vand.u32 4294901760, %v1004_v63 }
  0x1e   :  { %v67_v61 = vsel %vm59_vm0, %v33_v27, 0  ;;  %v168_v30 = vand.u32 4294901760, %v167_v56  ;;  %v231_v11 = vand.u32 4294901760, %v230_v44  ;;  %v248_v57 = vsub.f32 %v2362_v54, %v2953_v33  ;;  %v26_v44 = vld [vmem:[%s2921_s0 + $0x18] sm:$0xff]  ;;  %s2189_s0 = smov [#allocation2]  }
  0x1f   :  { %v243_v8 = vand.u32 4294901760, %v242_v20  ;;  %v2555_v39 = vand.u32 4294901760, %v67_v61  ;;  %1925 = vmatprep.subr.bf16.mxu0 %v1924_v3  ;;  %v2020_v10 = vpack.c.bf16 %v1005_v15, %v998_v6  ;;  %v2950_v58 = vand.u32 4294901760, %v2364_v55  ;;  %v30_v56 = vld [vmem:[%s2922_s1 + $0x18] sm:$0xff]  ;;  %s1686_s1 = sshll.u32 %s2189_s0, 4  ;;  %s1687_s1 = int_to_ptr.vmem [resolvable:$true] %s1686_s1 }
  0x20   :  { %v2975_v9 = vand.u32 4294901760, %v2301_v29  ;;  %1789 = vmatmul.mubr.f32.vlgmr.msra.gmra.mrb[0].mxu1 %v168_v30  ;;  %169 = vmatmul.mubr.f32.gmra.mrb[2].mxu0 %v168_v30  ;;  %v2976_v3 = vand.u32 4294901760, %v2311_v34  ;;  %v249_v27 = vand.u32 4294901760, %v248_v57  ;;  %v34_v57 = vmul.f32 %v30_v56, %v26_v44  ;;  %s2162_s21 = scalar_lea.vmem %s1687_s1, 512  ;;  %p2167_p1 = scmp.lt.s32.totalorder %s1687_s1, %s1687_s1 }
  0x21   :  { %v1926_v63 = vpack.c.bf16 %v243_v8, %v231_v11  ;;  %v2573_v32 = vsub.f32 %v67_v61, %v2555_v39  ;;  %2019 = vmatpush3.bf16.msra.mxu1 %v2016_v35  ;;  %v260_v20 = vsub.f32 %v2364_v55, %v2950_v58  ;;  %v2956_v11 = vand.u32 4294901760, %v2401_v13  ;;  %p2163_p0 = scmp.ne.s32.totalorder %s1687_s1, %s2162_s21  ;;  %p2168_p2 = scmp.lt.s32.totalorder %s2162_s21, %s2162_s21 }
  0x22   :  { %v2564_v4 = vsub.f32 %v2301_v29, %v2975_v9  ;;  %v2578_v62 = vsub.f32 %v2311_v34, %v2976_v3  ;;  %v2951_v9 = vand.u32 4294901760, %v2383_v1  ;;  %v2977_v29 = vmov 0.0   ;;  %2021 = vmatprep.subr.bf16.mxu1 %v2020_v10 }
  0x23   :  { %174 = vmatprep.mubr.f32.mxu0 %v2977_v29  ;;  %1927 = vmatpush1.bf16.msra.mxu0 %v1926_v63  ;;  %v2588_v30 = vand.u32 4294901760, %v2573_v32  ;;  %v261_v6 = vand.u32 4294901760, %v260_v20  ;;  %v266_v61 = vsub.f32 %v2401_v13, %v2956_v11  ;;  %v2966_v63 = vand.u32 4294901760, %v2405_v19  ;;  %p2169_p3 = por %p2168_p2, %p2167_p1 }
  0x24   :  { %v2952_v8 = vand.u32 4294901760, %v2564_v4  ;;  %v1017_v34 = vand.u32 4294901760, %v2578_v62  ;;  %v254_v35 = vsub.f32 %v2383_v1, %v2951_v9  ;;  %v70_v44 = vsel %vm59_vm0, %v34_v57, 0 }
  0x25   :  { %2978 = vst [vmem:[#allocation12_spill] sm:$0xff] %v2588_v30  ;;  %v178_v3 = vsub.f32 %v2573_v32, %v2588_v30  ;;  %2023 = vmatpush3.bf16.msra.mxu1 %v2020_v10  ;;  %v1928_v56 = vpack.c.bf16 %v261_v6, %v249_v27  ;;  %v2607_v33 = vand.u32 4294901760, %v70_v44  ;;  %v272_v40 = vsub.f32 %v2405_v19, %v2966_v63  ;;  %p2170_p4 = pnand %p2169_p3, %p2163_p0 }
  0x26   :  { %v1011_v15 = vsub.f32 %v2564_v4, %v2952_v8  ;;  %v1018_v58 = vsub.f32 %v2578_v62, %v1017_v34  ;;  %v255_v9 = vand.u32 4294901760, %v254_v35  ;;  %v267_v8 = vand.u32 4294901760, %v266_v61 }
  0x27   :  { %v179_v36 = vand.u32 4294901760, %v178_v3  ;;  %v2964_v30 = vand.u32 4294901760, %v2410_v21  ;;  %1929 = vmatprep.subr.bf16.mxu0 %v1928_v56  ;;  %v2614_v35 = vsub.f32 %v70_v44, %v2607_v33  ;;  %v2979_v10 = vand.u32 4294901760, %v2342_v47 }
  0x28   :  { %v1012_v20 = vand.u32 4294901760, %v1011_v15  ;;  %v1019_v11 = vand.u32 4294901760, %v1018_v58  ;;  %v1930_v22 = vpack.c.bf16 %v267_v8, %v255_v9  ;;  %v2980_v57 = vand.u32 4294901760, %v2355_v52 }
  0x29   :  { %v2619_v27 = vsub.f32 %v2342_v47, %v2979_v10  ;;  %180 = vmatmul.mubr.f32.gmra.mrb[4].mxu0 %v179_v36  ;;  %v273_v15 = vand.u32 4294901760, %v272_v40  ;;  %v284_v9 = vsub.f32 %v2410_v21, %v2964_v30  ;;  %1791 = vmatprep.mubr.f32.mxu1 %v179_v36  ;;  %v2963_v8 = vand.u32 4294901760, %v2418_v28 }
  0x2a   :  { %v2624_v58 = vsub.f32 %v2355_v52, %v2980_v57  ;;  %v2024_v6 = vpack.c.bf16 %v1019_v11, %v1012_v20  ;;  %1931 = vmatpush1.bf16.msra.mxu0 %v1930_v22  ;;  %185 = vmatprep.mubr.f32.mxu0 %v2977_v29  ;;  %v2632_v47 = vand.u32 4294901760, %v2614_v35  ;;  %v289_v11 = vand.u32 4294901760, %v2444_v45 }
  0x2b   :  { %v2965_v61 = vand.u32 4294901760, %v2619_v27  ;;  %v285_v40 = vand.u32 4294901760, %v284_v9  ;;  %v278_v36 = vsub.f32 %v2418_v28, %v2963_v8  ;;  %v1936_v30 = vpack.c.bf16 %v2267_v18, %v2265_v17 }
  0x2c   :  { %v2967_v52 = vand.u32 4294901760, %v2624_v58  ;;  %2025 = vmatprep.subr.bf16.mxu1 %v2024_v6  ;;  %v189_v22 = vsub.f32 %v2614_v35, %v2632_v47  ;;  %v290_v56 = vsub.f32 %v2444_v45, %v289_v11 }
  0x2d   :  { %2027 = vmatpush3.bf16.msra.mxu1 %v2024_v6  ;;  %v1025_v3 = vsub.f32 %v2619_v27, %v2965_v61  ;;  %v1932_v20 = vpack.c.bf16 %v285_v40, %v273_v15  ;;  %v279_v10 = vand.u32 4294901760, %v278_v36  ;;  %v1938_v15 = vpack.c.bf16 %v2290_v26, %v2288_v25 }
  0x2e   :  { %v1032_v44 = vsub.f32 %v2624_v58, %v2967_v52  ;;  %v190_v57 = vand.u32 4294901760, %v189_v22  ;;  %v291_v8 = vand.u32 4294901760, %v290_v56  ;;  %v2032_v52 = vpack.c.bf16 %v2449_v46, %v2433_v38 }
  0x2f   :  { %v1026_v9 = vand.u32 4294901760, %v1025_v3  ;;  %1933 = vmatprep.subr.bf16.mxu0 %v1932_v20  ;;  %v2981_v40 = vand.u32 4294901760, %v2265_v17  ;;  %v2982_v36 = vand.u32 4294901760, %v2267_v18  ;;  %v2036_v3 = vpack.c.bf16 %v2513_v2, %v2508_v7 }
  0x30   :  { %v1033_v6 = vand.u32 4294901760, %v1032_v44  ;;  %191 = vmatmul.mubr.f32.gmra.mrb[6].mxu0 %v190_v57  ;;  %v1934_v63 = vpack.c.bf16 %v291_v8, %v279_v10  ;;  %1792 = vmatmul.mubr.f32.gmra.mrb[2].mxu1 %v190_v57  ;;  %v1940_v8 = vpack.c.bf16 %v2324_v42, %v2304_v31  ;;  %v1942_v17 = vpack.c.bf16 %v2348_v50, %v2346_v49 }
  0x31   :  { %341 = vmatprep.mubr.f32.mxu0 %v2977_v29  ;;  %1810 = vmatprep.mubr.f32.mxu1 %v2469_v59  ;;  %v2663_v22 = vpack.c.bf16 %v2982_v36, %v2981_v40  ;;  %v1944_v18 = vpack.c.bf16 %v2364_v55, %v2362_v54  ;;  %v1950_v44 = vpack.c.bf16 %v2444_v45, %v2418_v28  ;;  %v2985_v56 = vand.u32 4294901760, %v2449_v46 }
  0x32   :  { %v2028_v61 = vpack.c.bf16 %v1033_v6, %v1026_v9  ;;  %1935 = vmatpush1.bf16.msra.mxu0 %v1934_v63  ;;  %v1946_v63 = vpack.c.bf16 %v2401_v13, %v2383_v1  ;;  %v2987_v10 = vand.u32 4294901760, %v2288_v25  ;;  %v2988_v57 = vand.u32 4294901760, %v2290_v26  ;;  %v2993_v25 = vld [vmem:[#allocation11_spill] sm:$0xff] }
  0x33   :  { %1937 = vmatprep.subr.bf16.mxu0 %v1936_v30  ;;  %v2040_v30 = vpack.c.bf16 %v2578_v62, %v2564_v4  ;;  %v2990_v46 = vand.u32 4294901760, %v2324_v42  ;;  %v2994_v26 = vand.u32 4294901760, %v2346_v49  ;;  %v2995_v36 = vand.u32 4294901760, %v2348_v50  ;;  %v2999_v49 = vld [vmem:[#allocation12_spill] sm:$0xff] }
  0x34   :  { %2029 = vmatprep.subr.bf16.mxu1 %v2028_v61  ;;  %v1970_v9 = vpack.c.bf16 %v2988_v57, %v2987_v10  ;;  %v2997_v42 = vand.u32 4294901760, %v2364_v55  ;;  %v3000_v50 = vand.u32 4294901760, %v2383_v1  ;;  %v3006_v1 = vand.u32 4294901760, %v2418_v28 }
  0x35   :  { %2031 = vmatpush3.bf16.msra.mxu1 %v2028_v61  ;;  %343 = vmatmul.mubr.f32.vlgmr.msra.gmra.mrb[0].mxu0 %v2469_v59  ;;  %v1948_v61 = vpack.c.bf16 %v2410_v21, %v2405_v19 }
  0x36   :  { %2033 = vmatprep.subr.bf16.mxu1 %v2032_v52  ;;  %1939 = vmatpush1.bf16.msra.mxu0 %v1938_v15  ;;  %v2992_v15 = vand.u32 4294901760, %v2513_v2 }
  0x37   :  { %348 = vmatprep.mubr.f32.mxu0 %v2977_v29  ;;  %1941 = vmatprep.subr.bf16.mxu0 %v1940_v8  ;;  %v3002_v8 = vand.u32 4294901760, %v2405_v19 }
  0x38   :  { %1811 = vmatmul.mubr.f32.vlgmr.msra.gmra.mrb[0].mxu1 %v2498_v60 }
  0x39   :  { %2035 = vmatpush3.bf16.msra.mxu1 %v2032_v52  ;;  %350 = vmatmul.mubr.f32.gmra.mrb[2].mxu0 %v2498_v60  ;;  %v2044_v52 = vpack.c.bf16 %v2624_v58, %v2619_v27 }
  0x3a   :  { %2037 = vmatprep.subr.bf16.mxu1 %v2036_v3  ;;  %1813 = vmatprep.mubr.f32.mxu1 %v2555_v39 }
  0x3b   :  { %1943 = vmatpush1.bf16.msra.mxu0 %v1942_v17  ;;  %355 = vmatprep.mubr.f32.mxu0 %v2977_v29 }
  0x3c   :  { %1945 = vmatprep.subr.bf16.mxu0 %v1944_v18  ;;  %1814 = vmatmul.mubr.f32.gmra.mrb[2].mxu1 %v2607_v33  ;;  %v3007_v18 = vld [vmem:[#allocation9_spill] sm:$0xff] }
  0x3d   :  { %2039 = vmatpush3.bf16.msra.mxu1 %v2036_v3  ;;  %357 = vmatmul.mubr.f32.gmra.mrb[4].mxu0 %v2555_v39  ;;  %v3005_v3 = vand.u32 4294901760, %v2624_v58 }
  0x3e   :  { %2041 = vmatprep.subr.bf16.mxu1 %v2040_v30  ;;  %1832 = vmatprep.mubr.f32.mxu1 %v2484_v37 }
  0x3f   :  { %1947 = vmatpush1.bf16.msra.mxu0 %v1946_v63  ;;  %362 = vmatprep.mubr.f32.mxu0 %v2977_v29  ;;  %v3008_v63 = vld [vmem:[#allocation5_spill] sm:$0xff] }
  0x40   :  { %1949 = vmatprep.subr.bf16.mxu0 %v1948_v61 }
  0x41   :  { %2043 = vmatpush3.bf16.msra.mxu1 %v2040_v30  ;;  %364 = vmatmul.mubr.f32.gmra.mrb[6].mxu0 %v2607_v33 }
  0x42   :  { %2045 = vmatprep.subr.bf16.mxu1 %v2044_v52  ;;  %466 = vmatprep.mubr.f32.mxu0 %v2977_v29 }
  0x43   :  { %1951 = vmatpush1.bf16.msra.mxu0 %v1950_v44 }
  0x44   :  { %1953 = vmatprep.subr.bf16.mxu0 %v2263_v16 }
  0x45   :  { %2047 = vmatpush3.bf16.msra.mxu1 %v2044_v52  ;;  %v3009_v52 = vld [vmem:[#allocation6_spill] sm:$0xff] }
  0x46   :  { %2049 = vmatprep.subr.bf16.mxu1 %v2284_v23  ;;  %469 = vmatmul.mubr.f32.vlgmr.msra.gmra.mrb[0].mxu0 %v2484_v37  ;;  %v2983_v37 = vld [vmem:[#allocation7_spill] sm:$0xff] }
  0x47   :  { %1955 = vmatpush1.bf16.msra.mxu0 %v2286_v24  ;;  %474 = vmatprep.mubr.f32.mxu0 %v2977_v29 }
  0x48   :  { %1833 = vmatmul.mubr.f32.vlgmr.msra.gmra.mrb[0].mxu1 %v2518_v5  ;;  %1957 = vmatprep.subr.bf16.mxu0 %v2322_v41 }
  0x49   :  { %2051 = vmatpush3.bf16.msra.mxu1 %v2284_v23  ;;  %1835 = vmatprep.mubr.f32.mxu1 %v2573_v32 }
  0x4a   :  { %2053 = vmatprep.subr.bf16.mxu1 %v2330_v43  ;;  %477 = vmatmul.mubr.f32.gmra.mrb[2].mxu0 %v2518_v5  ;;  %v2984_v5 = vand.u32 4294901760, %v2433_v38  ;;  %v2989_v38 = vand.u32 4294901760, %v2304_v31  ;;  %v2996_v31 = vand.u32 4294901760, %v2362_v54  ;;  %v3001_v54 = vand.u32 4294901760, %v2401_v13 }
  0x4b   :  { %1959 = vmatpush1.bf16.msra.mxu0 %v2344_v48  ;;  %482 = vmatprep.mubr.f32.mxu0 %v2977_v29  ;;  %v1982_v13 = vpack.c.bf16 %v289_v11, %v3006_v1 }
  0x4c   :  { %1961 = vmatprep.subr.bf16.mxu0 %v2350_v51  ;;  %1836 = vmatmul.mubr.f32.gmra.mrb[2].mxu1 %v2614_v35  ;;  %v2064_v20 = vpack.c.bf16 %v2985_v56, %v2984_v5  ;;  %v1972_v6 = vpack.c.bf16 %v2990_v46, %v2989_v38  ;;  %v1978_v55 = vpack.c.bf16 %v3001_v54, %v3000_v50 }
  0x4d   :  { %2055 = vmatpush3.bf16.msra.mxu1 %v2330_v43  ;;  %1854 = vmatprep.mubr.f32.mxu1 %v2496_v53 }
  0x4e   :  { %2057 = vmatprep.subr.bf16.mxu1 %v2381_v0  ;;  %485 = vmatmul.mubr.f32.gmra.mrb[4].mxu0 %v2573_v32  ;;  %v2986_v32 = vld [vmem:[#allocation10_spill] sm:$0xff] }
  0x4f   :  { %1963 = vmatpush1.bf16.msra.mxu0 %v2399_v12  ;;  %490 = vmatprep.mubr.f32.mxu0 %v2977_v29 }
  0x50   :  { %1965 = vmatprep.subr.bf16.mxu0 %v2403_v14 }
  0x51   :  { %2059 = vmatpush3.bf16.msra.mxu1 %v2381_v0 }
  0x52   :  { %2061 = vmatprep.subr.bf16.mxu1 %v2983_v37  ;;  %493 = vmatmul.mubr.f32.gmra.mrb[6].mxu0 %v2614_v35  ;;  %v2991_v35 = vand.u32 4294901760, %v2508_v7  ;;  %v1976_v7 = vpack.c.bf16 %v2997_v42, %v2996_v31 }
  0x53   :  { %1967 = vmatpush1.bf16.msra.mxu0 %v2986_v32  ;;  %579 = vmatprep.mubr.f32.mxu0 %v2977_v29 }
  0x54   :  { %1969 = vmatprep.subr.bf16.mxu0 %v2663_v22  ;;  %v2068_v40 = vpack.c.bf16 %v2992_v15, %v2991_v35  ;;  %v1974_v22 = vpack.c.bf16 %v2995_v36, %v2994_v26 }
  0x55   :  { %2063 = vmatpush3.bf16.msra.mxu1 %v2983_v37 }
  0x56   :  { %2065 = vmatprep.subr.bf16.mxu1 %v2064_v20  ;;  %583 = vmatmul.mubr.f32.vlgmr.msra.gmra.mrb[0].mxu0 %v2496_v53  ;;  %v2998_v53 = vand.u32 4294901760, %v2564_v4  ;;  %v3003_v4 = vand.u32 4294901760, %v2410_v21 }
  0x57   :  { %1971 = vmatpush1.bf16.msra.mxu0 %v1970_v9  ;;  %588 = vmatprep.mubr.f32.mxu0 %v2977_v29 }
  0x58   :  { %1855 = vmatmul.mubr.f32.vlgmr.msra.gmra.mrb[0].mxu1 %v2993_v25  ;;  %1973 = vmatprep.subr.bf16.mxu0 %v1972_v6  ;;  %v2072_v2 = vpack.c.bf16 %v1017_v34, %v2998_v53  ;;  %v1980_v62 = vpack.c.bf16 %v3003_v4, %v3002_v8  ;;  %v3004_v34 = vand.u32 4294901760, %v2619_v27 }
  0x59   :  { %2067 = vmatpush3.bf16.msra.mxu1 %v2064_v20  ;;  %1857 = vmatprep.mubr.f32.mxu1 %v2999_v49 }
  0x5a   :  { %2069 = vmatprep.subr.bf16.mxu1 %v2068_v40  ;;  %592 = vmatmul.mubr.f32.gmra.mrb[2].mxu0 %v2993_v25  ;;  %v2076_v17 = vpack.c.bf16 %v3005_v3, %v3004_v34 }
  0x5b   :  { %1975 = vmatpush1.bf16.msra.mxu0 %v1974_v22  ;;  %597 = vmatprep.mubr.f32.mxu0 %v2977_v29 }
  0x5c   :  { %1977 = vmatprep.subr.bf16.mxu0 %v1976_v7  ;;  %1858 = vmatmul.mubr.f32.gmra.mrb[2].mxu1 %v2632_v47 }
  0x5d   :  { %2071 = vmatpush3.bf16.msra.mxu1 %v2068_v40  ;;  %1876 = vmatprep.mubr.f32.mxu1 %v2469_v59 }
  0x5e   :  { %2073 = vmatprep.subr.bf16.mxu1 %v2072_v2  ;;  %601 = vmatmul.mubr.f32.gmra.mrb[4].mxu0 %v2999_v49 }
  0x5f   :  { %1979 = vmatpush1.bf16.msra.mxu0 %v1978_v55  ;;  %606 = vmatprep.mubr.f32.mxu0 %v2977_v29 }
  0x60   :  { %1981 = vmatprep.subr.bf16.mxu0 %v1980_v62 }
  0x61   :  { %2075 = vmatpush3.bf16.msra.mxu1 %v2072_v2 }
  0x62   :  { %2077 = vmatprep.subr.bf16.mxu1 %v2076_v17  ;;  %610 = vmatmul.mubr.f32.gmra.mrb[6].mxu0 %v2632_v47 }
  0x63   :  { %1983 = vmatpush1.bf16.msra.mxu0 %v1982_v13  ;;  %728 = vmatprep.mubr.f32.mxu0 %v2977_v29 }
  0x64   :  { %1985 = vmatprep.subr.bf16.mxu0 %v2263_v16 }
  0x65   :  { %2079 = vmatpush3.bf16.msra.mxu1 %v2076_v17 }
  0x66   :  { %2081 = vmatprep.subr.bf16.mxu1 %v2284_v23  ;;  %730 = vmatmul.mubr.f32.vlgmr.msra.gmra.mrb[0].mxu0 %v2469_v59 }
  0x67   :  { %1987 = vmatpush1.bf16.msra.mxu0 %v2286_v24  ;;  %735 = vmatprep.mubr.f32.mxu0 %v2977_v29 }
  0x68   :  { %1877 = vmatmul.mubr.f32.vlgmr.msra.gmra.mrb[0].mxu1 %v2498_v60  ;;  %1989 = vmatprep.subr.bf16.mxu0 %v2322_v41 }
  0x69   :  { %2083 = vmatpush3.bf16.msra.mxu1 %v2284_v23  ;;  %1879 = vmatprep.mubr.f32.mxu1 %v2555_v39 }
  0x6a   :  { %2085 = vmatprep.subr.bf16.mxu1 %v2330_v43  ;;  %737 = vmatmul.mubr.f32.gmra.mrb[2].mxu0 %v2498_v60 }
  0x6b   :  { %1991 = vmatpush1.bf16.msra.mxu0 %v2344_v48  ;;  %742 = vmatprep.mubr.f32.mxu0 %v2977_v29 }
  0x6c   :  { %1993 = vmatprep.subr.bf16.mxu0 %v2350_v51  ;;  %1880 = vmatmul.mubr.f32.gmra.mrb[2].mxu1 %v2607_v33 }
  0x6d   :  { %2087 = vmatpush3.bf16.msra.mxu1 %v2330_v43  ;;  %1898 = vmatprep.mubr.f32.mxu1 %v2469_v59  ;;  %v1532_v43 = vlaneseq }
  0x6e   :  { %2089 = vmatprep.subr.bf16.mxu1 %v2381_v0  ;;  %744 = vmatmul.mubr.f32.gmra.mrb[4].mxu0 %v2555_v39 }
  0x6f   :  { %1995 = vmatpush1.bf16.msra.mxu0 %v2399_v12  ;;  %749 = vmatprep.mubr.f32.mxu0 %v2977_v29  ;;  %v2818_v11 = vshrl.u32 %v1532_v43, 7 }
  0x70   :  { %1997 = vmatprep.subr.bf16.mxu0 %v2403_v14 }
  0x71   :  { %2091 = vmatpush3.bf16.msra.mxu1 %v2381_v0  ;;  %v1607_v0 = vand.u32 127, %v1532_v43  ;;  %v1537_v15 = vand.u32 15, %v2818_v11  ;;  %vm1549_vm3 = vcmp.lt.s32.totalorder %v2818_v11, 1  ;;  %vm1566_vm4 = vcmp.lt.s32.totalorder %v2818_v11, 7 }
  0x72   :  { %2093 = vmatprep.subr.bf16.mxu1 %v2983_v37  ;;  %751 = vmatmul.mubr.f32.gmra.mrb[6].mxu0 %v2607_v33  ;;  %v1534_v40 = vadd.s32 8, %v2818_v11  ;;  %v1536_v54 = vadd.s32 24, %v2818_v11 }
  0x73   :  { %1999 = vmatpush1.bf16.msra.mxu0 %v2986_v32  ;;  %837 = vmatprep.mubr.f32.mxu0 %v2977_v29  ;;  %vm1608_vm1 = vcmp.eq.s32.totalorder %v1607_v0, 0  ;;  %vm1621_vm2 = vcmp.eq.s32.totalorder %v1607_v0, 15  ;;  %v1535_v32 = vadd.s32 16, %v2818_v11  ;;  %vm2839_vm6 = vcmp.eq.s32.totalorder %v1537_v15, 0 }
  0x74   :  { %v1538_v7 = vand.u32 15, %v1534_v40  ;;  %v1540_v1 = vand.u32 15, %v1536_v54 }
  0x75   :  { %2095 = vmatpush3.bf16.msra.mxu1 %v2983_v37  ;;  %v3010_v37 = vld [vmem:[#allocation8_spill] sm:$0xff]  ;;  %v1539_v35 = vand.u32 15, %v1535_v32 }
  0x76   :  { %839 = vmatmul.mubr.f32.vlgmr.msra.gmra.mrb[0].mxu0 %v2469_v59  ;;  %vm2850_vm7 = vcmp.eq.s32.totalorder %v1538_v7, 15  ;;  %vm2864_vm9 = vcmp.eq.s32.totalorder %v1540_v1, 15 }
  0x77   :  { %844 = vmatprep.mubr.f32.mxu0 %v2977_v29  ;;  %vm2829_vm5 = vcmp.eq.s32.totalorder %v1539_v35, 0 }
  0x78   :  { %1899 = vmatmul.mubr.f32.vlgmr.msra.gmra.mrb[0].mxu1 %v2498_v60 }
  0x79   :  { %1901 = vmatprep.mubr.f32.mxu1 %v2555_v39 }
  0x7a   :  { %846 = vmatmul.mubr.f32.gmra.mrb[2].mxu0 %v2498_v60 }
  0x7b   :  { %851 = vmatprep.mubr.f32.mxu0 %v2977_v29 }
  0x7c   :  { %1902 = vmatmul.mubr.f32.gmra.mrb[2].mxu1 %v2607_v33 }
  0x7d   :  { %v1614_v23 = vpop.permute.xlu1 %1613 }
  0x7e   :  { %853 = vmatmul.mubr.f32.gmra.mrb[4].mxu0 %v2555_v39  ;;  %v1619_v19 = vsel %vm1608_vm1, -inf, %v1614_v23 }
  0x7f   :  { %858 = vmatprep.mubr.f32.mxu0 %v2977_v29 }
  0x80   :  { %v1610_v16 = vpop.permute.xlu0 %1609 }
  0x81   :  { %v1617_v45 = vsel %vm1608_vm1, -inf, %v1610_v16 }
  0x82   :  { %860 = vmatmul.mubr.f32.gmra.mrb[6].mxu0 %v2607_v33 }
  0x83   :  { %v1616_v41 = vpop.permute.xlu1 %1615 }
  0x84   :  { %v1612_v24 = vpop.permute.xlu0 %1611  ;;  %v1620_v59 = vsel %vm1608_vm1, -inf, %v1616_v41 }
  0x85   :  { %v1618_v21 = vsel %vm1608_vm1, -inf, %v1612_v24 }
  0x87   :  { %v1625_v51 = vpop.permute.xlu1 %1624 }
  0x88   :  { %v1623_v48 = vpop.permute.xlu0 %1622  ;;  %v1631_v28 = vsel %vm1621_vm2, -inf, %v1625_v51 }
  0x89   :  { %v1630_v60 = vsel %vm1621_vm2, -inf, %v1623_v48  ;;  %v1635_v29 = vmax.f32 %v1618_v21, %v1631_v28 }
  0x8a   :  { %v1634_v58 = vmax.f32 %v1617_v45, %v1630_v60 }
  0x8b   :  { %v1629_v14 = vpop.permute.xlu1 %1628  ;;  %v1639_v30 = vmax.f32 %v3007_v18, %v1635_v29 }
  0x8c   :  { %v1627_v12 = vpop.permute.xlu0 %1626  ;;  %v1633_v33 = vsel %vm1621_vm2, -inf, %v1629_v14  ;;  %v1638_v44 = vmax.f32 %v3009_v52, %v1634_v58 }
  0x8d   :  { %v1632_v39 = vsel %vm1621_vm2, -inf, %v1627_v12  ;;  %v1637_v47 = vmax.f32 %v1620_v59, %v1633_v33  ;;  %v1643_v56 = vrot.slane %v1639_v30, 7  ;;  %v1655_v46 = vrot.slane %v1639_v30, 1 }
  0x8e   :  { %v1636_v27 = vmax.f32 %v1619_v19, %v1632_v39  ;;  %v1642_v10 = vrot.slane %v1638_v44, 7  ;;  %v1654_v6 = vrot.slane %v1638_v44, 1 }
  0x8f   :  { %v1641_v5 = vmax.f32 %v3010_v37, %v1637_v47 }
  0x90   :  { %v1640_v61 = vmax.f32 %v3008_v63, %v1636_v27  ;;  %v1660_v49 = vsel %vm1566_vm4, %v1654_v6, %v1655_v46  ;;  %v1648_v62 = vsel %vm1549_vm3, %v1642_v10, %v1643_v56 }
  0x91   :  { %v1645_v57 = vrot.slane %v1641_v5, 7  ;;  %v1657_v9 = vrot.slane %v1641_v5, 1 }
  0x92   :  { %v1644_v20 = vrot.slane %v1640_v61, 7  ;;  %v1656_v38 = vrot.slane %v1640_v61, 1 }
  0x93   :  { %v1649_v42 = vsel %vm1549_vm3, %v1645_v57, %v1642_v10  ;;  %v1661_v13 = vsel %vm1566_vm4, %v1657_v9, %v1654_v6 }
  0x94   :  { %v1647_v26 = vsel %vm1549_vm3, %v1643_v56, %v1644_v20  ;;  %v1658_v22 = vsel %vm1566_vm4, %v1656_v38, %v1657_v9  ;;  %v1650_v2 = vsel %vm2839_vm6, -inf, %v1649_v42  ;;  %v1659_v8 = vsel %vm1566_vm4, %v1655_v46, %v1656_v38 }
  0x95   :  { %v1652_v36 = vsel %vm2829_vm5, -inf, %v1647_v26  ;;  %v1666_v50 = vmax.f32 %v1650_v2, %v1660_v49  ;;  %v1663_v34 = vsel %vm2850_vm7, -inf, %v1659_v8  ;;  %v1646_v16 = vsel %vm1549_vm3, %v1644_v20, %v1645_v57 }
  0x96   :  { %v1668_v53 = vmax.f32 %v1652_v36, %v1658_v22  ;;  %v1667_v17 = vmax.f32 %v1648_v62, %v1663_v34  ;;  %v1665_v41 = vsel %vm2864_vm9, -inf, %v1661_v13 }
  0x97   :  { %v1670_v3 = vmax.f32 %v1638_v44, %v1666_v50  ;;  %v1669_v43 = vmax.f32 %v1646_v16, %v1665_v41 }
  0x98   :  { %v1672_v4 = vmax.f32 %v1640_v61, %v1668_v53  ;;  %v1671_v23 = vmax.f32 %v1639_v30, %v1667_v17 }
  0x99   :  { %1675 = vst.msk [vmem:[#allocation2] sm:$0xff] %vm1674_vm8, %v1670_v3  ;;  %v1673_v48 = vmax.f32 %v1641_v5, %v1669_v43 }
  0x9a   :  { %1677 = vst.msk [vmem:[#allocation2 + $0x10] sm:$0xff] %vm1674_vm8, %v1672_v4  ;;  %1676 = vst.msk [vmem:[#allocation2 + $0x8] sm:$0xff] %vm1674_vm8, %v1671_v23 }
  0x9b   :  { %1678 = vst.msk [vmem:[#allocation2 + $0x18] sm:$0xff] %vm1674_vm8, %v1673_v48 }
  0x9c   :  { %2173 = shalt.err (!%p2170_p4)
}
  0x9d   :  { %s2174_s23 = scalar_lea.hbm %s2927_s6, 512 }
  0x9e   :  { %p2175_p5 = scmp.ne.s32.totalorder %s2927_s6, %s2174_s23  ;;  %p2178_p6 = scmp.lt.u32.totalorder %s2174_s23, %s2927_s6 }
  0xa0   :  { %p2180_p7 = pnand %p2178_p6, %p2175_p5 }
  0xa2   :  { %2183 = shalt.err (!%p2180_p7)
}
  0xa3   :  { %s2190_s28 = smov 128   ;;  %s2191_s29 = smov 8   ;;  %v1699_v56 = vld [vmem:[%s2925_s4] ss:$0 sm:$0xff] }
  0xa4   :  { %1692 = dma.vmem_to_hbm [thread:$0]  %s1687_s1, 512, %s2927_s6, [#allocation3], %s2190_s28, %s2190_s28, %s2191_s29  }
 0x149   :  { %v840_v51 = vpop.f32.mrb[0].mxu0 }
 0x14a   :  { %v842_v12 = vpop.f32.mrb[1].mxu0  ;;  %v1545_v39 = vrot.slane %v840_v51, 7 }
 0x14b   :  { %v1900_v0 = vpop.f32.mrb[0].mxu1 }
 0x14c   :  { %v1563_v14 = vrot.slane %v1900_v0, 1  ;;  %v1510_v19 = vpop.f32.mrb[1].mxu1 }
 0x14d   :  { %v1562_v21 = vrot.slane %v1510_v19, 1  ;;  %v847_v28 = vpop.f32.mrb[2].mxu0 }
 0x14e   :  { %v1546_v59 = vrot.slane %v847_v28, 7  ;;  %v849_v33 = vpop.f32.mrb[3].mxu0 }
 0x14f   :  { %v1569_v45 = vsel %vm1566_vm4, %v1562_v21, %v1563_v14  ;;  %v1903_v60 = vpop.f32.mrb[2].mxu1 }
 0x150   :  { %v1565_v29 = vrot.slane %v1903_v60, 1  ;;  %v1522_v27 = vpop.f32.mrb[3].mxu1  ;;  %v1552_v58 = vsel %vm1549_vm3, %v1545_v39, %v1546_v59 }
 0x151   :  { %v1564_v47 = vrot.slane %v1522_v27, 1  ;;  %v1576_v18 = vadd.f32 %v1552_v58, %v849_v33  ;;  %v854_v30 = vpop.f32.mrb[4].mxu0 }
 0x152   :  { %v1570_v63 = vsel %vm1566_vm4, %v1565_v29, %v1562_v21  ;;  %v1547_v52 = vrot.slane %v854_v30, 7  ;;  %v856_v44 = vpop.f32.mrb[5].mxu0 }
 0x153   :  { %v1568_v61 = vsel %vm1566_vm4, %v1563_v14, %v1564_v47  ;;  %v1567_v37 = vsel %vm1566_vm4, %v1564_v47, %v1565_v29  ;;  %v1574_v7 = vsel %vm2864_vm9, 0.0, %v1570_v63 }
 0x154   :  { %v1572_v5 = vsel %vm2850_vm7, 0.0, %v1568_v61  ;;  %v1551_v32 = vsel %vm1549_vm3, %v1546_v59, %v1547_v52 }
 0x155   :  { %v1580_v20 = vadd.f32 %v1576_v18, %v1572_v5  ;;  %v1556_v10 = vsel %vm2829_vm5, 0.0, %v1551_v32  ;;  %v861_v57 = vpop.f32.mrb[6].mxu0 }
 0x156   :  { %v1577_v38 = vadd.f32 %v1556_v10, %v856_v44  ;;  %v1548_v46 = vrot.slane %v861_v57, 7  ;;  %v863_v6 = vpop.f32.mrb[7].mxu0 }
 0x157   :  { %v1591_v9 = vadd.f32 %v1699_v56, %v1580_v20 }
 0x158   :  { %v1581_v15 = vadd.f32 %v1577_v38, %v1567_v37  ;;  %v1553_v40 = vsel %vm1549_vm3, %v1548_v46, %v1545_v39  ;;  %v1550_v26 = vsel %vm1549_vm3, %v1547_v52, %v1548_v46 }
 0x159   :  { %v1595_v35 = vmax.f32 %v1591_v9, 0.0  ;;  %v1554_v36 = vsel %vm2839_vm6, 0.0, %v1553_v40  ;;  %v1578_v22 = vadd.f32 %v1550_v26, %v863_v6 }
 0x15a   :  { %v1592_v25 = vadd.f32 %v1699_v56, %v1581_v15  ;;  %v1575_v42 = vadd.f32 %v1554_v36, %v842_v12 }
 0x15b   :  { %1599 = vst [vmem:[%s2926_s5 + $0x8] sm:$0xff] %v1595_v35  ;;  %v1582_v53 = vadd.f32 %v1578_v22, %v1574_v7 }
 0x15c   :  { %v1596_v2 = vmax.f32 %v1592_v25, 0.0  ;;  %v1579_v49 = vadd.f32 %v1575_v42, %v1569_v45 }
 0x15d   :  { %v1593_v50 = vadd.f32 %v1699_v56, %v1582_v53 }
 0x15e   :  { %1600 = vst [vmem:[%s2926_s5 + $0x10] sm:$0xff] %v1596_v2  ;;  %v1590_v11 = vadd.f32 %v1699_v56, %v1579_v49 }
 0x15f   :  { %v1597_v31 = vmax.f32 %v1593_v50, 0.0 }
 0x160   :  { %v1594_v54 = vmax.f32 %v1590_v11, 0.0 }
 0x161   :  { %1601 = vst [vmem:[%s2926_s5 + $0x18] sm:$0xff] %v1597_v31 }
 0x162   :  { %1598 = vst [vmem:[%s2926_s5] sm:$0xff] %v1594_v54 }
 0x163   :  { %2184 = dma.done.wait [#allocation3], 512  }
 0x164   :  { %2185 = vsyncadd [#allocation3], 4294966784 }
 0x165   :  { %1698 = vsyncpa [#allocation3], 1 }

</bundles_post_ra>
